<compile_context>
chip_gen: v5e
topology: v5e:2x2
jax: 0.10.0
libtpu: 0.0.40
codegen_flags: <defaults>
</compile_context>

<pallas_src>
import jax
import jax.numpy as jnp
from jax.experimental import pallas as pl
from jax.experimental.pallas import tpu as pltpu

_EPS = 1e-5
_INV_SQRT2 = 0.7071067811865476
_VMEM_LIMIT = 48 * 1024 * 1024          # safe on v5e/v6e (128 MiB) and v7x (64 MiB)
_FUSED_MAX_F32_BYTES = 2 * 1024 * 1024  # whole-tensor-in-VMEM fusion threshold
_TR_CAP = 256                           # row-tile cap (multiple of 8/16/32)
_TL_CAP = 4096                          # lane-tile cap (multiple of 128)


def _gelu_exact(y):
    """Exact (erf-based) GELU matching torch.nn.GELU() default.

    erf via Abramowitz-Stegun 7.1.26 (|abs err| <= 1.5e-7): one EUP exp plus a
    short Horner polynomial, instead of the long VALU-heavy rational expansion
    XLA emits for lax.erf.
    """
    p = jnp.float32(0.3275911)
    a1 = jnp.float32(0.254829592)
    a2 = jnp.float32(-0.284496736)
    a3 = jnp.float32(1.421413741)
    a4 = jnp.float32(-1.453152027)
    a5 = jnp.float32(1.061405429)
    z = jnp.abs(y) * jnp.float32(_INV_SQRT2)          # evaluate erf at |y|/sqrt(2)
    t = 1.0 / (1.0 + p * z)                           # recip (EUP) + refine
    poly = ((((a5 * t + a4) * t + a3) * t + a2) * t + a1) * t
    erf_abs = 1.0 - poly * jnp.exp(-z * z)            # EUP exp
    erf_y = jnp.where(y >= 0, erf_abs, -erf_abs)      # erf is odd
    return 0.5 * y * (1.0 + erf_y)


def _row_unit(dtype):
    # Sublane packing: f32 -> 8 rows/vreg, bf16 -> 16, int8/fp8 -> 32.
    return max(8, 32 // jnp.dtype(dtype).itemsize)


def _pick_tiles(NC, HW, dtype):
    unit = _row_unit(dtype)
    TR = NC if NC < unit else min(_TR_CAP, (NC // unit) * unit)
    TL = HW if HW < 128 else min(_TL_CAP, (HW // 128) * 128)
    # Megacore (v7x has 2 TensorCores): ensure the parallel axes have >= 2
    # blocks whenever the lane axis is wide enough to split.
    if pl.cdiv(NC, TR) * pl.cdiv(HW, TL) < 2 and HW >= 256:
        TL = 128 * pl.cdiv(pl.cdiv(HW, 2), 128)
    return TR, TL


def bn_gelu(x_nchw, gamma, beta, eps=_EPS, force_two_pass=False):
    """BatchNorm2d (training-mode forward, biased variance) + exact GELU.

    x_nchw: (N, C, H, W); gamma, beta: (C,).  Returns (N, C, H, W).
    """
    N, C, H, W = x_nchw.shape
    NC, HW = N * C, H * W
    out_dtype = x_nchw.dtype
    gamma_f = gamma.astype(jnp.float32)
    beta_f = beta.astype(jnp.float32)

    # ---------- Fused path: whole tensor resident in VMEM (1 read + 1 write).
    if not force_two_pass and NC * HW * 4 <= _FUSED_MAX_F32_BYTES:
        x3 = x_nchw.reshape(N, C, HW)           # free, contiguous view of NCHW
        inv_cnt = 1.0 / float(N * HW)

        def fused_kernel(x_ref, g_ref, b_ref, o_ref):
            x = x_ref[...].astype(jnp.float32)
            s = jnp.sum(jnp.sum(x, axis=2, keepdims=True), axis=0, keepdims=True)
            q = jnp.sum(jnp.sum(x * x, axis=2, keepdims=True), axis=0, keepdims=True)
            mean = s * jnp.float32(inv_cnt)
            var = jnp.maximum(q * jnp.float32(inv_cnt) - mean * mean, 0.0)
            inv_std = jax.lax.rsqrt(var + jnp.float32(eps))
            scale = g_ref[...].reshape(1, C, 1) * inv_std
            shift = b_ref[...].reshape(1, C, 1) - mean * scale
            o_ref[...] = _gelu_exact(x * scale + shift).astype(o_ref.dtype)

        out3 = pl.pallas_call(
            fused_kernel,
            out_shape=jax.ShapeDtypeStruct((N, C, HW), out_dtype),
            in_specs=[pl.BlockSpec(memory_space=pltpu.MemorySpace.VMEM)] * 3,
            out_specs=pl.BlockSpec(memory_space=pltpu.MemorySpace.VMEM),
            compiler_params=pltpu.CompilerParams(vmem_limit_bytes=_VMEM_LIMIT),
        )(x3, gamma_f.reshape(C, 1), beta_f.reshape(C, 1))
        return out3.reshape(N, C, H, W)

    # ---------- Two-pass tiled path (stats sweep + elementwise apply).
    x2 = x_nchw.reshape(NC, HW)                 # free, contiguous view of NCHW
    TR, TL = _pick_tiles(NC, HW, out_dtype)
    grid = (pl.cdiv(NC, TR), pl.cdiv(HW, TL))
    col_tail = (HW % TL) != 0                   # tail lane tile needs masking

    def stats_kernel(x_ref, stat_ref):
        # Grid: (row tiles [parallel], lane tiles [arbitrary, reduction last]).
        # stat block (TR, 2): lane 0 = sum, lane 1 = sum of squares.
        k = pl.program_id(1)

        @pl.when(k == 0)
        def _():
            stat_ref[...] = jnp.zeros_like(stat_ref)

        x = x_ref[...].astype(jnp.float32)
        if col_tail:
            valid = HW - k * TL
            col = jax.lax.broadcasted_iota(jnp.int32, x.shape, 1)
            x = jnp.where(col < valid, x, 0.0)
        stat_ref[:, 0:1] += jnp.sum(x, axis=1, keepdims=True)
        stat_ref[:, 1:2] += jnp.sum(x * x, axis=1, keepdims=True)

    stats = pl.pallas_call(
        stats_kernel,
        out_shape=jax.ShapeDtypeStruct((NC, 2), jnp.float32),
        grid=grid,
        in_specs=[pl.BlockSpec((TR, TL), lambda i, k: (i, k))],
        out_specs=pl.BlockSpec((TR, 2), lambda i, k: (i, 0)),
        compiler_params=pltpu.CompilerParams(
            dimension_semantics=("parallel", "arbitrary"),
            vmem_limit_bytes=_VMEM_LIMIT,
        ),
    )(x2)

    # Tiny per-channel finalize (O(N*C) work, negligible HBM traffic).
    # TODO(synk): E[x^2]-mean^2 can lose precision for huge-magnitude inputs;
    # switch to shifted sums if tighter agreement with PyTorch is required.
    cnt = jnp.float32(N * HW)
    s = jnp.sum(stats[:, 0].reshape(N, C), axis=0)
    q = jnp.sum(stats[:, 1].reshape(N, C), axis=0)
    mean = s / cnt
    var = jnp.maximum(q / cnt - mean * mean, 0.0)        # biased batch variance
    inv_std = jax.lax.rsqrt(var + jnp.float32(eps))
    scale = gamma_f * inv_std                            # (C,)
    shift = beta_f - mean * scale                        # (C,)
    scale_shift = jnp.stack(
        [jnp.broadcast_to(scale[None, :], (N, C)).reshape(NC),
         jnp.broadcast_to(shift[None, :], (N, C)).reshape(NC)],
        axis=1,
    )                                                    # (NC, 2)

    def apply_kernel(x_ref, ss_ref, o_ref):
        x = x_ref[...].astype(jnp.float32)
        y = x * ss_ref[:, 0:1] + ss_ref[:, 1:2]          # folded affine
        o_ref[...] = _gelu_exact(y).astype(o_ref.dtype)

    out2 = pl.pallas_call(
        apply_kernel,
        out_shape=jax.ShapeDtypeStruct((NC, HW), out_dtype),
        grid=grid,
        in_specs=[
            pl.BlockSpec((TR, TL), lambda i, j: (i, j)),
            pl.BlockSpec((TR, 2), lambda i, j: (i, 0)),
        ],
        out_specs=pl.BlockSpec((TR, TL), lambda i, j: (i, j)),
        compiler_params=pltpu.CompilerParams(
            dimension_semantics=("parallel", "parallel"),
            vmem_limit_bytes=_VMEM_LIMIT,
        ),
    )(x2, scale_shift)

    return out2.reshape(N, C, H, W)


def _reference(x_nchw, gamma, beta, eps=_EPS):
    x = x_nchw.astype(jnp.float32)
    mean = jnp.mean(x, axis=(0, 2, 3), keepdims=True)
    var = jnp.mean(jnp.square(x - mean), axis=(0, 2, 3), keepdims=True)
    y = (x - mean) * jax.lax.rsqrt(var + eps)
    y = y * gamma.reshape(1, -1, 1, 1) + beta.reshape(1, -1, 1, 1)
    return 0.5 * y * (1.0 + jax.lax.erf(y * jnp.float32(_INV_SQRT2)))


if __name__ == "__main__":
    key = jax.random.PRNGKey(0)
    kx, kg, kb, kx2, kg2, kb2 = jax.random.split(key, 6)

    # Primary check (module-scale input): exercises the fused in-VMEM path.
    N, C, H, W = 2, 4, 16, 16
    x = jax.random.normal(kx, (N, C, H, W), dtype=jnp.float32) * 2.0 + 0.5
    gamma = 1.0 + 0.1 * jax.random.normal(kg, (C,), dtype=jnp.float32)
    beta = 0.1 * jax.random.normal(kb, (C,), dtype=jnp.float32)

    out = jax.block_until_ready(bn_gelu(x, gamma, beta))
    ref = _reference(x, gamma, beta)
    assert out.shape == (N, C, H, W)
    assert jnp.allclose(out, ref, atol=1e-4, rtol=1e-4)

    # Secondary check: force the tiled two-pass path, including partial
    # (non-8/128-divisible) row/lane tiles with masked tail reduction.
    N2, C2, H2, W2 = 2, 6, 12, 12
    x_b = jax.random.normal(kx2, (N2, C2, H2, W2), dtype=jnp.float32) - 0.25
    g_b = 1.0 + 0.1 * jax.random.normal(kg2, (C2,), dtype=jnp.float32)
    b_b = 0.1 * jax.random.normal(kb2, (C2,), dtype=jnp.float32)

    out_b = jax.block_until_ready(bn_gelu(x_b, g_b, b_b, force_two_pass=True))
    ref_b = _reference(x_b, g_b, b_b)
    assert jnp.allclose(out_b, ref_b, atol=1e-4, rtol=1e-4)

    # TODO(synk): training-mode running_mean/running_var buffer updates are a
    # module side effect, not part of the forward output, and are not emitted.

    print("KERNEL_OK")
</pallas_src>

<mosaic_0001>
module attributes {stable_mosaic.version = 11 : i64} {
  func.func @fused_kernel(%arg0: memref<2x4x256xf32, #tpu.memory_space<vmem>>, %arg1: memref<4x1xf32, #tpu.memory_space<vmem>>, %arg2: memref<4x1xf32, #tpu.memory_space<vmem>>, %arg3: memref<2x4x256xf32, #tpu.memory_space<vmem>>) attributes {dimension_semantics = [], scalar_prefetch = 0 : i64, scratch_operands = 0 : i64, tpu.core_type = #tpu.core_type<tc>} {
    %c0 = arith.constant 0 : index
    %c0_0 = arith.constant 0 : index
    %c0_1 = arith.constant 0 : index
    %0 = vector.load %arg0[%c0, %c0_0, %c0_1] : memref<2x4x256xf32, #tpu.memory_space<vmem>>, vector<2x4x256xf32>
    %cst = arith.constant dense<0.000000e+00> : vector<2x4xf32>
    %1 = vector.multi_reduction <add>, %0, %cst [2] : vector<2x4x256xf32> to vector<2x4xf32>
    %2 = vector.shape_cast %1 : vector<2x4xf32> to vector<2x4x1xf32>
    %cst_2 = arith.constant dense<0.000000e+00> : vector<4x1xf32>
    %3 = vector.multi_reduction <add>, %2, %cst_2 [0] : vector<2x4x1xf32> to vector<4x1xf32>
    %4 = vector.shape_cast %3 : vector<4x1xf32> to vector<1x4x1xf32>
    %5 = arith.mulf %0, %0 : vector<2x4x256xf32>
    %cst_3 = arith.constant dense<0.000000e+00> : vector<2x4xf32>
    %6 = vector.multi_reduction <add>, %5, %cst_3 [2] : vector<2x4x256xf32> to vector<2x4xf32>
    %7 = vector.shape_cast %6 : vector<2x4xf32> to vector<2x4x1xf32>
    %cst_4 = arith.constant dense<0.000000e+00> : vector<4x1xf32>
    %8 = vector.multi_reduction <add>, %7, %cst_4 [0] : vector<2x4x1xf32> to vector<4x1xf32>
    %9 = vector.shape_cast %8 : vector<4x1xf32> to vector<1x4x1xf32>
    %cst_5 = arith.constant 0.001953125 : f32
    %10 = vector.broadcast %cst_5 : f32 to vector<1x4x1xf32>
    %11 = arith.mulf %4, %10 : vector<1x4x1xf32>
    %cst_6 = arith.constant 0.001953125 : f32
    %12 = vector.broadcast %cst_6 : f32 to vector<1x4x1xf32>
    %13 = arith.mulf %9, %12 : vector<1x4x1xf32>
    %14 = arith.mulf %11, %11 : vector<1x4x1xf32>
    %15 = arith.subf %13, %14 : vector<1x4x1xf32>
    %cst_7 = arith.constant 0.000000e+00 : f32
    %16 = vector.broadcast %cst_7 : f32 to vector<1x4x1xf32>
    %17 = arith.maximumf %15, %16 : vector<1x4x1xf32>
    %cst_8 = arith.constant 9.99999974E-6 : f32
    %18 = vector.broadcast %cst_8 : f32 to vector<1x4x1xf32>
    %19 = arith.addf %17, %18 : vector<1x4x1xf32>
    %20 = math.rsqrt %19 : vector<1x4x1xf32>
    %c0_9 = arith.constant 0 : index
    %c0_10 = arith.constant 0 : index
    %21 = vector.load %arg1[%c0_9, %c0_10] : memref<4x1xf32, #tpu.memory_space<vmem>>, vector<4x1xf32>
    %22 = vector.shape_cast %21 : vector<4x1xf32> to vector<1x4x1xf32>
    %23 = arith.mulf %22, %20 : vector<1x4x1xf32>
    %c0_11 = arith.constant 0 : index
    %c0_12 = arith.constant 0 : index
    %24 = vector.load %arg2[%c0_11, %c0_12] : memref<4x1xf32, #tpu.memory_space<vmem>>, vector<4x1xf32>
    %25 = vector.shape_cast %24 : vector<4x1xf32> to vector<1x4x1xf32>
    %26 = arith.mulf %11, %23 : vector<1x4x1xf32>
    %27 = arith.subf %25, %26 : vector<1x4x1xf32>
    %28 = vector.broadcast %23 : vector<1x4x1xf32> to vector<2x4x256xf32>
    %29 = arith.mulf %0, %28 : vector<2x4x256xf32>
    %30 = vector.broadcast %27 : vector<1x4x1xf32> to vector<2x4x256xf32>
    %31 = arith.addf %29, %30 : vector<2x4x256xf32>
    %32 = math.absf %31 : vector<2x4x256xf32>
    %cst_13 = arith.constant 0.707106769 : f32
    %33 = vector.broadcast %cst_13 : f32 to vector<2x4x256xf32>
    %34 = arith.mulf %32, %33 : vector<2x4x256xf32>
    %cst_14 = arith.constant 0.327591091 : f32
    %35 = vector.broadcast %cst_14 : f32 to vector<2x4x256xf32>
    %36 = arith.mulf %35, %34 : vector<2x4x256xf32>
    %cst_15 = arith.constant 1.000000e+00 : f32
    %37 = vector.broadcast %cst_15 : f32 to vector<2x4x256xf32>
    %38 = arith.addf %37, %36 : vector<2x4x256xf32>
    %cst_16 = arith.constant 1.000000e+00 : f32
    %39 = vector.broadcast %cst_16 : f32 to vector<2x4x256xf32>
    %40 = arith.divf %39, %38 : vector<2x4x256xf32>
    %cst_17 = arith.constant 1.06140542 : f32
    %41 = vector.broadcast %cst_17 : f32 to vector<2x4x256xf32>
    %42 = arith.mulf %41, %40 : vector<2x4x256xf32>
    %cst_18 = arith.constant -1.45315206 : f32
    %43 = vector.broadcast %cst_18 : f32 to vector<2x4x256xf32>
    %44 = arith.addf %42, %43 : vector<2x4x256xf32>
    %45 = arith.mulf %44, %40 : vector<2x4x256xf32>
    %cst_19 = arith.constant 1.42141378 : f32
    %46 = vector.broadcast %cst_19 : f32 to vector<2x4x256xf32>
    %47 = arith.addf %45, %46 : vector<2x4x256xf32>
    %48 = arith.mulf %47, %40 : vector<2x4x256xf32>
    %cst_20 = arith.constant -0.284496725 : f32
    %49 = vector.broadcast %cst_20 : f32 to vector<2x4x256xf32>
    %50 = arith.addf %48, %49 : vector<2x4x256xf32>
    %51 = arith.mulf %50, %40 : vector<2x4x256xf32>
    %cst_21 = arith.constant 0.254829586 : f32
    %52 = vector.broadcast %cst_21 : f32 to vector<2x4x256xf32>
    %53 = arith.addf %51, %52 : vector<2x4x256xf32>
    %54 = arith.mulf %53, %40 : vector<2x4x256xf32>
    %cst_22 = arith.constant 0.000000e+00 : f32
    %55 = vector.broadcast %cst_22 : f32 to vector<2x4x256xf32>
    %56 = arith.subf %55, %34 : vector<2x4x256xf32>
    %57 = arith.mulf %56, %34 : vector<2x4x256xf32>
    %58 = math.exp %57 : vector<2x4x256xf32>
    %59 = arith.mulf %54, %58 : vector<2x4x256xf32>
    %cst_23 = arith.constant 1.000000e+00 : f32
    %60 = vector.broadcast %cst_23 : f32 to vector<2x4x256xf32>
    %61 = arith.subf %60, %59 : vector<2x4x256xf32>
    %cst_24 = arith.constant 0.000000e+00 : f32
    %62 = vector.broadcast %cst_24 : f32 to vector<2x4x256xf32>
    %63 = arith.cmpf oge, %31, %62 : vector<2x4x256xf32>
    %cst_25 = arith.constant 0.000000e+00 : f32
    %64 = vector.broadcast %cst_25 : f32 to vector<2x4x256xf32>
    %65 = arith.subf %64, %61 : vector<2x4x256xf32>
    %66 = arith.select %63, %61, %65 : vector<2x4x256xi1>, vector<2x4x256xf32>
    %cst_26 = arith.constant 5.000000e-01 : f32
    %67 = vector.broadcast %cst_26 : f32 to vector<2x4x256xf32>
    %68 = arith.mulf %67, %31 : vector<2x4x256xf32>
    %cst_27 = arith.constant 1.000000e+00 : f32
    %69 = vector.broadcast %cst_27 : f32 to vector<2x4x256xf32>
    %70 = arith.addf %69, %66 : vector<2x4x256xf32>
    %71 = arith.mulf %68, %70 : vector<2x4x256xf32>
    %c0_28 = arith.constant 0 : index
    %c0_29 = arith.constant 0 : index
    %c0_30 = arith.constant 0 : index
    %72 = vector.load %arg3[%c0_28, %c0_29, %c0_30] : memref<2x4x256xf32, #tpu.memory_space<vmem>>, vector<2x4x256xf32>
    tpu.vector_store %arg3[%c0_28, %c0_29, %c0_30], %71 {strides = array<i32>} : memref<2x4x256xf32, #tpu.memory_space<vmem>>, vector<2x4x256xf32>,
    return
  }
}

</mosaic_0001>

<bundles_post_ra>
// kernel: tpu_custom_call.1
= control target key start
LH: loop header
LB: loop body
LE: loop exit
PB: predicated region body
PF: predicated region fallthrough
CT: control target
= control target key end

     0   :  { %8 = vsyncpa [#allocation3], 0  ;;  %s380_s0 = inlined_call_operand.hbm [shape: f32[2,4,256], index: 0, kind: input, shape index: {}]   ;;  %s381_s1 = inlined_call_operand.vmem [shape: f32[4,1], index: 1, kind: input, shape index: {}]   ;;  %s382_s2 = inlined_call_operand.vmem [shape: f32[4,1], index: 2, kind: input, shape index: {}]   ;;  %s383_s3 = inlined_call_operand.hbm [shape: f32[2,4,256], index: 3, kind: output, shape index: {}]  }
   0x1   :  { %9 = vsyncpa [#allocation4], 0  ;;  %s14_s14 = sshll.u32 %s380_s0, 4  ;;  %s302_s15 = smov [#allocation2]   ;;  %s15_s14 = int_to_ptr.hbm [resolvable:$true] %s14_s14 }
   0x2   :  { %s16_s16 = sshll.u32 %s302_s15, 4  ;;  %s303_s17 = smov 128   ;;  %s17_s16 = int_to_ptr.vmem [resolvable:$true] %s16_s16 }
   0x3   :  { %s304_s18 = smov 8  }
   0x4   :  { %22 = dma.hbm_to_vmem [thread:$0]  %s15_s14, 256, %s17_s16, [#allocation3], %s303_s17, %s303_s17, %s304_s18  }
   0x5   :  { %298 = dma.done.wait [#allocation3], 256  }
   0x6   :  { %299 = vsyncadd [#allocation3], 4294967040  ;;  %v334_v0 = vld [vmem:[#allocation2] sm:$0xff]  ;;  %v336_v1 = vld [vmem:[#allocation2 + $0x8] sm:$0xff]  ;;  %vm46_vm0 = vcmask 1043456   ;;  %v305_v25 = vmov 0  }
   0x7   :  { %35 = vst [vmem:[#allocation1] ss:$2 sm:$0xff] %v334_v0  ;;  %v60_v2 = vmul.f32 %v334_v0, %v334_v0  ;;  %v61_v3 = vmul.f32 %v336_v1, %v336_v1  ;;  %238 = vset.pattern.permute.xlu2 %v305_v25  ;;  %239 = vset.pattern.permute.xlu0 %v305_v25  ;;  %v104_v47 = vld [vmem:[%s381_s1] sm:$0xf]  ;;  %v306_v53 = vmov 839922192  }
   0x8   :  { %39 = vst [vmem:[#allocation1 + $0x10] ss:$2 sm:$0xff] %v336_v1  ;;  %v106_v51 = vld [vmem:[%s382_s2] sm:$0xf]  ;;  %v114_v54 = vunpack.c.l.s4 %v306_v53  ;;  %s307_s1 = smov [#allocation5]   ;;  %s219_s24 = sshll.u32 %s383_s3, 4  ;;  %s220_s24 = int_to_ptr.hbm [resolvable:$true] %s219_s24 }
   0x9   :  { %s217_s2 = sshll.u32 %s307_s1, 4  ;;  %s218_s2 = int_to_ptr.vmem [resolvable:$true] %s217_s2 }
   0xa   :  { %v115_v56 = vunpack.c.0.s8 %v114_v54 }
   0xe   :  { %v36_v4 = vld.sshfl [vmem:[#allocation1] sm:$0xff pattern:$0x75316420]  ;;  %v37_v5 = vld.sshfl [vmem:[#allocation1 + $0x8] sm:$0xff pattern:$0x75316420] }
   0xf   :  { %v47_v6 = vsel %vm46_vm0, %v36_v4, 0.0  ;;  %v48_v7 = vsel %vm46_vm0, %v37_v5, 0.0  ;;  %64 = vst [vmem:[#allocation1] ss:$2 sm:$0xff] %v60_v2 }
  0x10   :  { %v49_v8 = vadd.f32 %v48_v7, %v47_v6  ;;  %v40_v9 = vld.sshfl [vmem:[#allocation1 + $0x10] sm:$0xff pattern:$0x75316420]  ;;  %v41_v10 = vld.sshfl [vmem:[#allocation1 + $0x18] sm:$0xff pattern:$0x75316420] }
  0x11   :  { %68 = vst [vmem:[#allocation1 + $0x10] ss:$2 sm:$0xff] %v61_v3  ;;  %v52_v11 = vsel %vm46_vm0, %v40_v9, 0.0  ;;  %v53_v12 = vsel %vm46_vm0, %v41_v10, 0.0 }
  0x12   :  { %50 = vadd.xlane.f32.xlu0 %v49_v8  ;;  %v54_v15 = vadd.f32 %v53_v12, %v52_v11 }
  0x16   :  { %v65_v13 = vld.sshfl [vmem:[#allocation1] sm:$0xff pattern:$0x75316420]  ;;  %v66_v14 = vld.sshfl [vmem:[#allocation1 + $0x8] sm:$0xff pattern:$0x75316420] }
  0x17   :  { %v75_v16 = vsel %vm46_vm0, %v65_v13, 0.0  ;;  %v76_v17 = vsel %vm46_vm0, %v66_v14, 0.0 }
  0x18   :  { %v77_v18 = vadd.f32 %v76_v17, %v75_v16  ;;  %v69_v19 = vld.sshfl [vmem:[#allocation1 + $0x10] sm:$0xff pattern:$0x75316420]  ;;  %v70_v20 = vld.sshfl [vmem:[#allocation1 + $0x18] sm:$0xff pattern:$0x75316420] }
  0x19   :  { %v80_v21 = vsel %vm46_vm0, %v69_v19, 0.0  ;;  %v81_v22 = vsel %vm46_vm0, %v70_v20, 0.0 }
  0x1a   :  { %78 = vadd.xlane.f32.xlu1 %v77_v18  ;;  %55 = vadd.xlane.f32.xlu0 %v54_v15  ;;  %v82_v23 = vadd.f32 %v81_v22, %v80_v21 }
  0x22   :  { %83 = vadd.xlane.f32.xlu1 %v82_v23 }
  0x85   :  { %v51_v24 = vpop.xlane.xlu0 %50 }
  0x86   :  { %v57_v29 = vsel %vm46_vm0, %v51_v24, 0.0 }
  0x8d   :  { %v79_v26 = vpop.xlane.xlu1 %78  ;;  %v56_v27 = vpop.xlane.xlu0 %55 }
  0x8e   :  { %v58_v28 = vsel %vm46_vm0, %v56_v27, 0.0  ;;  %v85_v33 = vsel %vm46_vm0, %v79_v26, 0.0 }
  0x8f   :  { %v59_v30 = vadd.f32 %v58_v28, %v57_v29 }
  0x91   :  { %v88_v31 = vmul.f32 0.001953125, %v59_v30 }
  0x93   :  { %v90_v36 = vmul.f32 %v88_v31, %v88_v31 }
  0x95   :  { %v84_v32 = vpop.xlane.xlu1 %83 }
  0x96   :  { %v86_v34 = vsel %vm46_vm0, %v84_v32, 0.0 }
  0x97   :  { %v87_v35 = vadd.f32 %v86_v34, %v85_v33 }
  0x99   :  { %v89_v37 = vmul.f32 0.001953125, %v87_v35 }
  0x9b   :  { %v91_v38 = vsub.f32 %v89_v37, %v90_v36 }
  0x9d   :  { %v92_v39 = vmax.f32 %v91_v38, 0.0 }
  0x9f   :  { %v93_v40 = vadd.f32 1e-05, %v92_v39 }
  0xa1   :  { %240 = vrsqrt.f32 %v93_v40  ;;  %vm100_vm2 = vweird.f32 %v93_v40 }
  0xa7   :  { %v241_v41 = vpop.eup %240 }
  0xa8   :  { %v95_v42 = vmul.f32 %v241_v41, %v93_v40  ;;  %vm101_vm1 = vweird.f32 %v241_v41 }
  0xa9   :  { %vm102_vm3 = vmor %vm100_vm2, %vm101_vm1 }
  0xaa   :  { %v96_v43 = vmul.f32 %v241_v41, %v95_v42 }
  0xac   :  { %v97_v44 = vmul.f32 0.5, %v96_v43 }
  0xae   :  { %v98_v45 = vsub.f32 1.5, %v97_v44 }
  0xb0   :  { %v99_v46 = vmul.f32 %v241_v41, %v98_v45 }
  0xb2   :  { %v103_v48 = vsel %vm102_vm3, %v241_v41, %v99_v46 }
  0xb3   :  { %v105_v49 = vmul.f32 %v104_v47, %v103_v48 }
  0xb5   :  { %111 = vperm.xlu2 %238, %v105_v49   ;;  %v107_v50 = vmul.f32 %v105_v49, %v88_v31 }
  0xb7   :  { %v108_v52 = vsub.f32 %v106_v51, %v107_v50 }
  0xbd   :  { %122 = vperm.xlu2 %238, %v108_v52  }
 0x10f   :  { %v112_v55 = vpop.permute.xlu2 %111 }
 0x110   :  { %v116_v57 = vperm.slane %v112_v55, %v115_v56 }
 0x112   :  { %v118_v59 = vmul.f32 %v116_v57, %v334_v0  ;;  %v119_v60 = vmul.f32 %v116_v57, %v336_v1 }
 0x117   :  { %v123_v58 = vpop.permute.xlu2 %122 }
 0x118   :  { %v127_v61 = vperm.slane %v123_v58, %v115_v56 }
 0x11a   :  { %v364_v62 = vadd.f32 %v127_v61, %v118_v59  ;;  %v366_v63 = vadd.f32 %v127_v61, %v119_v60 }
 0x11c   :  { %v131_v2 = vand.u32 2147483647, %v364_v62  ;;  %v132_v3 = vand.u32 2147483647, %v366_v63  ;;  %vm199_vm12 = vcmp.ge.f32.partialorder %v364_v62, 0.0  ;;  %vm200_vm13 = vcmp.ge.f32.partialorder %v366_v63, 0.0 }
 0x11e   :  { %v133_v4 = vmul.f32 0.70710677, %v131_v2  ;;  %v134_v5 = vmul.f32 0.70710677, %v132_v3  ;;  %v205_v2 = vmul.f32 0.5, %v364_v62 }
 0x120   :  { %v135_v6 = vmul.f32 0.3275911, %v133_v4  ;;  %v136_v7 = vmul.f32 0.3275911, %v134_v5  ;;  %v187_v27 = vsub.f32 0.0, %v133_v4  ;;  %v188_v30 = vsub.f32 0.0, %v134_v5 }
 0x122   :  { %v137_v8 = vadd.f32 1.0, %v135_v6  ;;  %v138_v9 = vadd.f32 1.0, %v136_v7  ;;  %v189_v34 = vmul.f32 %v187_v27, %v133_v4  ;;  %v190_v36 = vmul.f32 %v188_v30, %v134_v5 }
 0x123   :  { %v206_v4 = vmul.f32 0.5, %v366_v63 }
 0x124   :  { %242 = vrcp.f32 %v137_v8  ;;  %v150_v13 = vand.u32 2147483648, %v137_v8  ;;  %v148_v16 = vand.u32 2147483647, %v137_v8  ;;  %v165_v17 = vand.u32 2147483648, %v138_v9 }
 0x125   :  { %244 = vrcp.f32 %v138_v9  ;;  %v163_v19 = vand.u32 2147483647, %v138_v9  ;;  %vm144_vm6 = vweird.f32 %v137_v8  ;;  %vm159_vm8 = vweird.f32 %v138_v9 }
 0x126   :  { %v151_v21 = vor.u32 1.1754944e-38, %v150_v13  ;;  %vm149_vm9 = vcmp.eq.f32.partialorder %v148_v16, 8.507059e+37  ;;  %v166_v24 = vor.u32 1.1754944e-38, %v165_v17  ;;  %v191_v40 = vmul.f32 1.442695, %v189_v34 }
 0x127   :  { %vm164_vm11 = vcmp.eq.f32.partialorder %v163_v19, 8.507059e+37  ;;  %v193_v42 = vmul.f32 1.442695, %v190_v36 }
 0x128   :  { %246 = vpow2.f32 %v191_v40 }
 0x129   :  { %248 = vpow2.f32 %v193_v42 }
 0x12a   :  { %v243_v0 = vpop.eup %242 }
 0x12b   :  { %v245_v10 = vpop.eup %244  ;;  %v140_v1 = vmul.f32 %v243_v0, %v137_v8  ;;  %vm145_vm4 = vweird.f32 %v243_v0 }
 0x12c   :  { %v155_v11 = vmul.f32 %v245_v10, %v138_v9  ;;  %vm160_vm5 = vweird.f32 %v245_v10  ;;  %vm146_vm7 = vmor %vm144_vm6, %vm145_vm4 }
 0x12d   :  { %v141_v12 = vsub.f32 1.0, %v140_v1  ;;  %vm161_vm10 = vmor %vm159_vm8, %vm160_vm5 }
 0x12e   :  { %v156_v14 = vsub.f32 1.0, %v155_v11  ;;  %v247_v51 = vpop.eup %246 }
 0x12f   :  { %v142_v15 = vmul.f32 %v243_v0, %v141_v12  ;;  %v249_v53 = vpop.eup %248 }
 0x130   :  { %v157_v18 = vmul.f32 %v245_v10, %v156_v14 }
 0x131   :  { %v143_v20 = vadd.f32 %v243_v0, %v142_v15 }
 0x132   :  { %v158_v22 = vadd.f32 %v245_v10, %v157_v18 }
 0x133   :  { %v147_v23 = vsel %vm146_vm7, %v243_v0, %v143_v20 }
 0x134   :  { %v152_v25 = vsel %vm149_vm9, %v151_v21, %v147_v23  ;;  %v162_v26 = vsel %vm161_vm10, %v245_v10, %v158_v22 }
 0x135   :  { %v167_v28 = vsel %vm164_vm11, %v166_v24, %v162_v26  ;;  %v169_v29 = vmul.f32 1.0614054, %v152_v25 }
 0x136   :  { %v170_v31 = vmul.f32 1.0614054, %v167_v28 }
 0x137   :  { %v171_v32 = vadd.f32 -1.4531521, %v169_v29 }
 0x138   :  { %v172_v33 = vadd.f32 -1.4531521, %v170_v31 }
 0x139   :  { %v173_v35 = vmul.f32 %v171_v32, %v152_v25 }
 0x13a   :  { %v174_v37 = vmul.f32 %v172_v33, %v167_v28 }
 0x13b   :  { %v175_v38 = vadd.f32 1.4214138, %v173_v35 }
 0x13c   :  { %v176_v39 = vadd.f32 1.4214138, %v174_v37 }
 0x13d   :  { %v177_v41 = vmul.f32 %v175_v38, %v152_v25 }
 0x13e   :  { %v178_v43 = vmul.f32 %v176_v39, %v167_v28 }
 0x13f   :  { %v179_v44 = vadd.f32 -0.28449672, %v177_v41 }
 0x140   :  { %v180_v45 = vadd.f32 -0.28449672, %v178_v43 }
 0x141   :  { %v181_v46 = vmul.f32 %v179_v44, %v152_v25 }
 0x142   :  { %v182_v47 = vmul.f32 %v180_v45, %v167_v28 }
 0x143   :  { %v183_v48 = vadd.f32 0.2548296, %v181_v46 }
 0x144   :  { %v184_v49 = vadd.f32 0.2548296, %v182_v47 }
 0x145   :  { %v185_v50 = vmul.f32 %v183_v48, %v152_v25 }
 0x146   :  { %v186_v52 = vmul.f32 %v184_v49, %v167_v28 }
 0x147   :  { %v195_v54 = vmul.f32 %v247_v51, %v185_v50 }
 0x148   :  { %v196_v55 = vmul.f32 %v249_v53, %v186_v52 }
 0x149   :  { %v197_v56 = vsub.f32 1.0, %v195_v54 }
 0x14a   :  { %v198_v57 = vsub.f32 1.0, %v196_v55 }
 0x14b   :  { %v201_v58 = vsub.f32 0.0, %v197_v56 }
 0x14c   :  { %v202_v59 = vsub.f32 0.0, %v198_v57 }
 0x14d   :  { %v203_v60 = vsel %vm199_vm12, %v197_v56, %v201_v58 }
 0x14e   :  { %v204_v61 = vsel %vm200_vm13, %v198_v57, %v202_v59  ;;  %v207_v3 = vadd.f32 1.0, %v203_v60 }
 0x14f   :  { %v208_v5 = vadd.f32 1.0, %v204_v61 }
 0x150   :  { %v209_v6 = vmul.f32 %v207_v3, %v205_v2 }
 0x151   :  { %v210_v7 = vmul.f32 %v208_v5, %v206_v4 }
 0x152   :  { %211 = vst [vmem:[#allocation5] sm:$0xff] %v209_v6 }
 0x153   :  { %212 = vst [vmem:[#allocation5 + $0x8] sm:$0xff] %v210_v7 }
 0x154   :  { %225 = dma.vmem_to_hbm [thread:$0]  %s218_s2, 256, %s220_s24, [#allocation4], %s303_s17, %s303_s17, %s304_s18  }
 0x155   :  { %300 = dma.done.wait [#allocation4], 256  }
 0x156   :  { %301 = vsyncadd [#allocation4], 4294967040 }
 0x157   :  { %230 = vsyncpa [#allocation3], 1 }
 0x158   :  { %231 = vsyncpa [#allocation4], 1 }

</bundles_post_ra>
